<compile_context>
chip_gen: v5e
topology: v5e:2x2
jax: 0.10.0
libtpu: 0.0.40
codegen_flags: <defaults>
</compile_context>

<pallas_src>
import functools

import jax
import jax.numpy as jnp
from jax import lax
from jax.experimental import pallas as pl
from jax.experimental.pallas import tpu as pltpu

_LANES = 128
_SUBLANES = 8


def _grad_img_loss_kernel(x_ref, y_ref, out_ref, *, width, plane_len):
    """One grid step: partial loss over a (Bg, 8, Lp) block of flattened planes."""
    x = x_ref[...].astype(jnp.float32)
    y = y_ref[...].astype(jnp.float32)
    lp = x.shape[-1]

    col = lax.broadcasted_iota(jnp.int32, (1, _SUBLANES, lp), 2)
    # W-gradient valid where the +1 neighbour stays in the same image row
    # (and inside the un-padded plane).
    w_ok = jnp.logical_and(col < plane_len, (col % width) < (width - 1))
    # H-gradient valid where the +W neighbour stays inside the plane.
    h_ok = col < (plane_len - width)

    # Lane-axis rolls (Lp is a multiple of 128): rolled[..., i] == x[..., (i+s) % Lp]
    # for a roll amount of Lp - s.
    x1 = pltpu.roll(x, lp - 1, 2)       # +1 neighbour
    y1 = pltpu.roll(y, lp - 1, 2)
    xw = pltpu.roll(x, lp - width, 2)   # +W neighbour (next image row)
    yw = pltpu.roll(y, lp - width, 2)

    dw = jnp.abs(x1 - x) - jnp.abs(y1 - y)
    dh = jnp.abs(xw - x) - jnp.abs(yw - y)

    # Single fused reduction pass over both gradient terms.
    contrib = jnp.where(w_ok, dw * dw, 0.0) + jnp.where(h_ok, dh * dh, 0.0)
    out_ref[...] = jnp.reshape(jnp.sum(contrib), (1, 1, 1))


def _round_up(n, m):
    return ((n + m - 1) // m) * m


def _cdiv(a, b):
    return -(-a // b)


def _vmem_capacity_bytes():
    try:
        return int(pltpu.get_tpu_info().vmem_capacity_bytes)
    except Exception:
        return 64 * 1024 * 1024  # conservative fallback (v7x per-core VMEM)


def grad_img_loss(x, y):
    """Pallas implementation of GradImgLoss.forward(x, y) -> scalar float32."""
    assert x.shape == y.shape and x.ndim == 4
    N, C, H, W = x.shape
    P = N * C
    L = H * W
    Lp = _round_up(L, _LANES)  # lane padding only when H*W is not a 128 multiple

    itemsize = jnp.dtype(x.dtype).itemsize
    vmem_cap = _vmem_capacity_bytes()

    # Corrected VMEM budget (padded shapes): 2 inputs x 2 pipeline buffers of
    # the input block + ~8 block-sized f32 temporaries, under ~half of VMEM so
    # the compiler keeps comfortable headroom (vmem_limit below is 3/4 of VMEM).
    group_in_bytes = _SUBLANES * Lp * itemsize   # one 8-plane group, one input
    group_f32_bytes = _SUBLANES * Lp * 4
    per_group_bytes = 2 * 2 * group_in_bytes + 8 * group_f32_bytes
    budget = vmem_cap // 2
    groups_per_block = max(1, budget // per_group_bytes)

    # Grid shaping: even number of blocks (>= 2) so dimension_semantics
    # ("parallel",) can shard across both v7x TensorCores.  Zero planes are
    # loss-exact, so padding the plane axis for divisibility is free of error.
    G = _cdiv(P, _SUBLANES)                     # number of 8-plane groups
    num_blocks = max(2, _cdiv(G, groups_per_block))
    if num_blocks % 2:
        num_blocks += 1
    Bg = _cdiv(G, num_blocks)                   # groups per block
    G_pad = num_blocks * Bg
    P_pad = G_pad * _SUBLANES

    # FREE contiguous reshapes only (no HBM transpose round trip).
    xf = x.reshape(P, L)
    yf = y.reshape(P, L)
    if P_pad != P or Lp != L:
        pads = ((0, P_pad - P), (0, Lp - L))
        xf = jnp.pad(xf, pads)
        yf = jnp.pad(yf, pads)
    xf = xf.reshape(G_pad, _SUBLANES, Lp)
    yf = yf.reshape(G_pad, _SUBLANES, Lp)

    in_spec = pl.BlockSpec((Bg, _SUBLANES, Lp), lambda i: (i, 0, 0))

    partials = pl.pallas_call(
        functools.partial(_grad_img_loss_kernel, width=W, plane_len=L),
        out_shape=jax.ShapeDtypeStruct((num_blocks, 1, 1), jnp.float32),
        grid=(num_blocks,),
        in_specs=[in_spec, in_spec],
        out_specs=pl.BlockSpec((1, 1, 1), lambda i: (i, 0, 0)),
        compiler_params=pltpu.CompilerParams(
            dimension_semantics=("parallel",),
            vmem_limit_bytes=int(max(32 * 1024 * 1024, (vmem_cap * 3) // 4)),
        ),
    )(xf, yf)

    return jnp.sum(partials)


def _reference(x, y):
    x = x.astype(jnp.float32)
    y = y.astype(jnp.float32)
    h_gx = jnp.abs(x[:, :, 1:, :] - x[:, :, :-1, :])
    h_gy = jnp.abs(y[:, :, 1:, :] - y[:, :, :-1, :])
    w_gx = jnp.abs(x[:, :, :, 1:] - x[:, :, :, :-1])
    w_gy = jnp.abs(y[:, :, :, 1:] - y[:, :, :, :-1])
    return jnp.sum((h_gx - h_gy) ** 2) + jnp.sum((w_gx - w_gy) ** 2)


if __name__ == "__main__":
    key = jax.random.PRNGKey(0)
    kx, ky = jax.random.split(key)
    # Small NCHW shapes consistent with an image-gradient loss.
    x = jax.random.normal(kx, (2, 4, 16, 16), dtype=jnp.float32)
    y = jax.random.normal(ky, (2, 4, 16, 16), dtype=jnp.float32)

    loss = jax.jit(grad_img_loss)(x, y)
    jax.block_until_ready(loss)

    ref = _reference(x, y)
    assert jnp.allclose(loss, ref, rtol=1e-5, atol=1e-3), (loss, ref)

    print("KERNEL_OK")
</pallas_src>

<mosaic_0001>
module attributes {stable_mosaic.version = 11 : i64} {
  func.func @_grad_img_loss_kernel(%arg0: i32, %arg1: memref<1x8x256xf32, #tpu.memory_space<vmem>>, %arg2: memref<1x8x256xf32, #tpu.memory_space<vmem>>, %arg3: memref<1x1x1xf32, #tpu.memory_space<vmem>>) attributes {dimension_semantics = [#tpu.dimension_semantics<parallel>], iteration_bounds = array<i64: 2>, scalar_prefetch = 0 : i64, scratch_operands = 0 : i64, tpu.core_type = #tpu.core_type<tc>, window_params = [{transform_indices = @transform_0, window_bounds = array<i64: 1, 8, 256>}, {transform_indices = @transform_1, window_bounds = array<i64: 1, 8, 256>}, {transform_indices = @transform_2, window_bounds = array<i64: 1, 1, 1>}]} {
    %c0 = arith.constant 0 : index
    %c0_0 = arith.constant 0 : index
    %c0_1 = arith.constant 0 : index
    %0 = vector.load %arg1[%c0, %c0_0, %c0_1] : memref<1x8x256xf32, #tpu.memory_space<vmem>>, vector<1x8x256xf32>
    %c0_2 = arith.constant 0 : index
    %c0_3 = arith.constant 0 : index
    %c0_4 = arith.constant 0 : index
    %1 = vector.load %arg2[%c0_2, %c0_3, %c0_4] : memref<1x8x256xf32, #tpu.memory_space<vmem>>, vector<1x8x256xf32>
    %2 = tpu.iota {dimensions = array<i32: 2>} : vector<1x8x256xi32>
    %c256_i32 = arith.constant 256 : i32
    %3 = vector.broadcast %c256_i32 : i32 to vector<1x8x256xi32>
    %4 = arith.cmpi slt, %2, %3 : vector<1x8x256xi32>
    %c16_i32 = arith.constant 16 : i32
    %c0_i32 = arith.constant 0 : i32
    %5 = arith.cmpi eq, %c16_i32, %c0_i32 : i32
    %c1_i32 = arith.constant 1 : i32
    %6 = arith.select %5, %c1_i32, %c16_i32 : i32
    %7 = vector.broadcast %6 : i32 to vector<1x8x256xi32>
    %8 = arith.remsi %2, %7 : vector<1x8x256xi32>
    %c0_i32_5 = arith.constant 0 : i32
    %9 = vector.broadcast %c0_i32_5 : i32 to vector<1x8x256xi32>
    %10 = arith.cmpi ne, %8, %9 : vector<1x8x256xi32>
    %c0_i32_6 = arith.constant 0 : i32
    %11 = vector.broadcast %c0_i32_6 : i32 to vector<1x8x256xi32>
    %12 = arith.cmpi slt, %8, %11 : vector<1x8x256xi32>
    %c0_i32_7 = arith.constant 0 : i32
    %13 = arith.cmpi slt, %6, %c0_i32_7 : i32
    %14 = vector.broadcast %13 : i1 to vector<1x8x256xi1>
    %15 = vector.broadcast %14 : vector<1x8x256xi1> to vector<1x8x256xi1>
    %16 = arith.xori %12, %15 : vector<1x8x256xi1>
    %17 = arith.andi %16, %10 : vector<1x8x256xi1>
    %18 = vector.broadcast %6 : i32 to vector<1x8x256xi32>
    %19 = arith.addi %8, %18 : vector<1x8x256xi32>
    %20 = arith.select %17, %19, %8 : vector<1x8x256xi1>, vector<1x8x256xi32>
    %c15_i32 = arith.constant 15 : i32
    %21 = vector.broadcast %c15_i32 : i32 to vector<1x8x256xi32>
    %22 = arith.cmpi slt, %20, %21 : vector<1x8x256xi32>
    %23 = arith.andi %4, %22 : vector<1x8x256xi1>
    %c240_i32 = arith.constant 240 : i32
    %24 = vector.broadcast %c240_i32 : i32 to vector<1x8x256xi32>
    %25 = arith.cmpi slt, %2, %24 : vector<1x8x256xi32>
    %c255_i32 = arith.constant 255 : i32
    %26 = tpu.dynamic_rotate %0 by %c255_i32 dim 2 : vector<1x8x256xf32>, i32 -> vector<1x8x256xf32>
    %c255_i32_8 = arith.constant 255 : i32
    %27 = tpu.dynamic_rotate %1 by %c255_i32_8 dim 2 : vector<1x8x256xf32>, i32 -> vector<1x8x256xf32>
    %c240_i32_9 = arith.constant 240 : i32
    %28 = tpu.dynamic_rotate %0 by %c240_i32_9 dim 2 : vector<1x8x256xf32>, i32 -> vector<1x8x256xf32>
    %c240_i32_10 = arith.constant 240 : i32
    %29 = tpu.dynamic_rotate %1 by %c240_i32_10 dim 2 : vector<1x8x256xf32>, i32 -> vector<1x8x256xf32>
    %30 = arith.subf %26, %0 : vector<1x8x256xf32>
    %31 = math.absf %30 : vector<1x8x256xf32>
    %32 = arith.subf %27, %1 : vector<1x8x256xf32>
    %33 = math.absf %32 : vector<1x8x256xf32>
    %34 = arith.subf %31, %33 : vector<1x8x256xf32>
    %35 = arith.subf %28, %0 : vector<1x8x256xf32>
    %36 = math.absf %35 : vector<1x8x256xf32>
    %37 = arith.subf %29, %1 : vector<1x8x256xf32>
    %38 = math.absf %37 : vector<1x8x256xf32>
    %39 = arith.subf %36, %38 : vector<1x8x256xf32>
    %40 = arith.mulf %34, %34 : vector<1x8x256xf32>
    %cst = arith.constant 0.000000e+00 : f32
    %41 = vector.broadcast %cst : f32 to vector<1x8x256xf32>
    %42 = arith.select %23, %40, %41 : vector<1x8x256xi1>, vector<1x8x256xf32>
    %43 = arith.mulf %39, %39 : vector<1x8x256xf32>
    %cst_11 = arith.constant 0.000000e+00 : f32
    %44 = vector.broadcast %cst_11 : f32 to vector<1x8x256xf32>
    %45 = arith.select %25, %43, %44 : vector<1x8x256xi1>, vector<1x8x256xf32>
    %46 = arith.addf %42, %45 : vector<1x8x256xf32>
    %47 = vector.shape_cast %46 : vector<1x8x256xf32> to vector<1x1x8x256xf32>
    %cst_12 = arith.constant dense<0.000000e+00> : vector<1xf32>
    %48 = vector.multi_reduction <add>, %47, %cst_12 [1, 2, 3] : vector<1x1x8x256xf32> to vector<1xf32>
    %49 = vector.shape_cast %48 : vector<1xf32> to vector<1x1x1x1xf32>
    %50 = vector.extract %49[0, 0, 0, 0] : f32 from vector<1x1x1x1xf32>
    %51 = vector.broadcast %50 : f32 to vector<1x1x1xf32>
    %c0_13 = arith.constant 0 : index
    %c0_14 = arith.constant 0 : index
    %c0_15 = arith.constant 0 : index
    %52 = vector.load %arg3[%c0_13, %c0_14, %c0_15] : memref<1x1x1xf32, #tpu.memory_space<vmem>>, vector<1x1x1xf32>
    tpu.vector_store %arg3[%c0_13, %c0_14, %c0_15], %51 {strides = array<i32>} : memref<1x1x1xf32, #tpu.memory_space<vmem>>, vector<1x1x1xf32>,
    return
  }
  func.func @transform_0(%arg0: i32) -> (i32, i32, i32) {
    %c0_i32 = arith.constant 0 : i32
    %c0_i32_0 = arith.constant 0 : i32
    %c0_i32_1 = arith.constant 0 : i32
    return %arg0, %c0_i32, %c0_i32_0 : i32, i32, i32
  }
  func.func @transform_1(%arg0: i32) -> (i32, i32, i32) {
    %c0_i32 = arith.constant 0 : i32
    %c0_i32_0 = arith.constant 0 : i32
    %c0_i32_1 = arith.constant 0 : i32
    return %arg0, %c0_i32, %c0_i32_0 : i32, i32, i32
  }
  func.func @transform_2(%arg0: i32) -> (i32, i32, i32) {
    %c0_i32 = arith.constant 0 : i32
    %c0_i32_0 = arith.constant 0 : i32
    %c0_i32_1 = arith.constant 0 : i32
    return %arg0, %c0_i32, %c0_i32_0 : i32, i32, i32
  }
}

</mosaic_0001>

<bundles_post_ra>
// kernel: grad_img_loss.1
= control target key start
LH: loop header
LB: loop body
LE: loop exit
PB: predicated region body
PF: predicated region fallthrough
CT: control target
= control target key end

     0   :  { %s377_s9 = smov 0   ;;  %s405_s0 = inlined_call_operand.vmem [shape: f32[2,8,256], index: 0, kind: input, shape index: {}]   ;;  %s406_s1 = inlined_call_operand.vmem [shape: f32[2,8,256], index: 1, kind: input, shape index: {}]   ;;  %s407_s2 = inlined_call_operand.vmem [shape: f32[2,1,1], index: 2, kind: output, shape index: {}]  }
   0x1 LB: > { %s327_s10 = sadd.s32 4294967295, %s358_s9   ;;  %p331_p0 = scmp.ge.s32.totalorder %s358_s9, 1  ;;  %s358_s9 = sphi %s377_s9, %s12_s9  }
   0x2   : > { %p122_p1 = scmp.lt.s32.totalorder %s358_s9, 3 }
   0x4   : > { %p123_p2 = pnand %p331_p0, %p122_p1 }
   0x5   : > { %p147_p3 = scmp.lt.s32.totalorder (!%p123_p2), %s327_s10, 1  ;;  %s360_s18 = smov (!%p123_p2), 127  }
   0x6   : > { %126 = sbr.rel (%p123_p2) target bundleno = 341 (0x155), region = 28  ;;  %s361_s19 = smov (!%p123_p2), 112  }
   0xb   : > { %s409_s10 = smov (!%p147_p3, %s327_s10), 1  ;;  %v164_v4 = vlaneseq  ;;  %vm266_vm5 = vcmask 0  }
   0xc   : > { %s338_s11 = sshll.u32 %s409_s10, 4  ;;  %s159_s22 = scalar_lea.vmem %s407_s2, %s409_s10 }
   0xd   : > { %s156_s14 = scalar_lea.vmem %s406_s1, %s338_s11  ;;  %s151_s17 = scalar_lea.vmem %s405_s0, %s338_s11  ;;  %v165_v8 = vand.u32 127, %v164_v4 }
   0xe   : > { %v162_v0 = vld [vmem:[%s156_s14] sm:$0xff]  ;;  %v163_v2 = vld [vmem:[%s156_s14 + $0x8] sm:$0xff] }
   0xf   : > { %v160_v1 = vld [vmem:[%s151_s17] sm:$0xff]  ;;  %206 = vrot.lane.b32.xlu1 %v162_v0, %s360_s18  ;;  %v161_v3 = vld [vmem:[%s151_s17 + $0x8] sm:$0xff]  ;;  %vm203_vm0 = vcmp.lt.s32.totalorder %v165_v8, 127  ;;  %vm216_vm1 = vcmp.lt.s32.totalorder %v165_v8, 112  ;;  %v166_v27 = vadd.s32 128, %v165_v8  ;;  %v173_v37 = vand.u32 15, %v165_v8 }
  0x10   : > { %199 = vrot.lane.b32.xlu0 %v160_v1, %s360_s18  ;;  %212 = vrot.lane.b32.xlu2 %v160_v1, %s361_s19 }
  0x11   : > { %v180_v39 = vand.u32 15, %v166_v27  ;;  %vm193_vm2 = vcmp.lt.s32.totalorder %v173_v37, 15  ;;  %vm198_vm4 = vcmp.lt.s32.totalorder %v166_v27, 240 }
  0x13   : > { %vm194_vm3 = vcmp.lt.s32.totalorder %v180_v39, 15 }
  0x17   : > { %208 = vrot.lane.b32.xlu1 %v163_v2, %s360_s18 }
  0x18   : > { %201 = vrot.lane.b32.xlu0 %v161_v3, %s360_s18  ;;  %214 = vrot.lane.b32.xlu2 %v161_v3, %s361_s19 }
  0x1f   : > { %221 = vrot.lane.b32.xlu1 %v163_v2, %s361_s19 }
  0x20   : > { %219 = vrot.lane.b32.xlu0 %v162_v0, %s361_s19 }
  0x6a   : > { %v213_v5 = vpop.permute.xlu2 %212 }
  0x72   : > { %v215_v13 = vpop.permute.xlu2 %214 }
  0x73   : > { %v217_v20 = vsel %vm216_vm1, %v213_v5, %v215_v13  ;;  %v218_v22 = vsel %vm216_vm1, %v215_v13, %v213_v5 }
  0x74   : > { %v235_v26 = vsub.f32 %v217_v20, %v160_v1  ;;  %v236_v28 = vsub.f32 %v218_v22, %v161_v3 }
  0x76   : > { %v237_v38 = vand.u32 2147483647, %v235_v26  ;;  %v238_v40 = vand.u32 2147483647, %v236_v28 }
  0x81   : > { %v207_v6 = vpop.permute.xlu1 %206 }
  0x82   : > { %v200_v7 = vpop.permute.xlu0 %199 }
  0x89   : > { %v209_v9 = vpop.permute.xlu1 %208 }
  0x8a   : > { %v202_v10 = vpop.permute.xlu0 %201  ;;  %v210_v11 = vsel %vm203_vm0, %v207_v6, %v209_v9  ;;  %v211_v12 = vsel %vm203_vm0, %v209_v9, %v207_v6 }
  0x8b   : > { %v204_v14 = vsel %vm203_vm0, %v200_v7, %v202_v10  ;;  %v205_v15 = vsel %vm203_vm0, %v202_v10, %v200_v7  ;;  %v229_v16 = vsub.f32 %v210_v11, %v162_v0  ;;  %v230_v17 = vsub.f32 %v211_v12, %v163_v2 }
  0x8c   : > { %v225_v18 = vsub.f32 %v204_v14, %v160_v1  ;;  %v226_v19 = vsub.f32 %v205_v15, %v161_v3 }
  0x8d   : > { %v231_v21 = vand.u32 2147483647, %v229_v16  ;;  %v232_v24 = vand.u32 2147483647, %v230_v17 }
  0x8e   : > { %v227_v23 = vand.u32 2147483647, %v225_v18  ;;  %v228_v25 = vand.u32 2147483647, %v226_v19 }
  0x90   : > { %v233_v31 = vsub.f32 %v227_v23, %v231_v21  ;;  %v234_v34 = vsub.f32 %v228_v25, %v232_v24 }
  0x91   : > { %v222_v29 = vpop.permute.xlu1 %221 }
  0x92   : > { %v220_v30 = vpop.permute.xlu0 %219  ;;  %v245_v43 = vmul.f32 %v233_v31, %v233_v31  ;;  %v246_v44 = vmul.f32 %v234_v34, %v234_v34 }
  0x93   : > { %v223_v32 = vsel %vm216_vm1, %v220_v30, %v222_v29  ;;  %v224_v33 = vsel %vm216_vm1, %v222_v29, %v220_v30 }
  0x94   : > { %v239_v35 = vsub.f32 %v223_v32, %v162_v0  ;;  %v240_v36 = vsub.f32 %v224_v33, %v163_v2  ;;  %v247_v49 = vsel %vm193_vm2, %v245_v43, 0.0  ;;  %v248_v50 = vsel %vm194_vm3, %v246_v44, 0.0 }
  0x96   : > { %v241_v41 = vand.u32 2147483647, %v239_v35  ;;  %v242_v42 = vand.u32 2147483647, %v240_v36 }
  0x98   : > { %v243_v45 = vsub.f32 %v237_v38, %v241_v41  ;;  %v244_v46 = vsub.f32 %v238_v40, %v242_v42 }
  0x9a   : > { %v250_v47 = vmul.f32 %v244_v46, %v244_v46  ;;  %v249_v48 = vmul.f32 %v243_v45, %v243_v45 }
  0x9c   : > { %v252_v51 = vsel %vm198_vm4, %v250_v47, 0.0  ;;  %v253_v52 = vadd.f32 %v249_v48, %v247_v49 }
  0x9d   : > { %v254_v53 = vadd.f32 %v252_v51, %v248_v50 }
  0x9f   : > { %v255_v54 = vadd.f32 %v254_v53, %v253_v52 }
  0xa1   : > { %256 = vadd.xlane.f32.xlu2 %v255_v54 }
 0x114   : > { %v257_v55 = vpop.xlane.xlu2 %256 }
 0x115   : > { %v258_v56 = vrot.slane %v257_v55, 4 }
 0x117   : > { %v259_v57 = vadd.f32 %v258_v56, %v257_v55 }
 0x119   : > { %v260_v58 = vrot.slane %v259_v57, 2 }
 0x11b   : > { %v261_v59 = vadd.f32 %v260_v58, %v259_v57 }
 0x11d   : > { %v262_v60 = vrot.slane %v261_v59, 1 }
 0x11f   : > { %v263_v61 = vadd.f32 %v262_v60, %v261_v59 }
 0x121   : > { %340 = vpush %v263_v61 }
 0x152   : > { %s341_s23 = spop %340 }
 0x153   : > { %v265_v62 = vstv %s341_s23 }
 0x154   : > { %267 = vst.msk [vmem:[%s159_s22] sm:$0x1] %vm266_vm5, %v265_v62 }
 0x155 PF: > { %s12_s9 = sadd.s32 1, %s358_s9  }
 0x156   : > { %p9_p4 = scmp.ge.s32.totalorder %s12_s9, 4  }
 0x158   :  { %11 = sbr.rel (!%p9_p4) target bundleno = 1 (0x1), region = 61 }

</bundles_post_ra>
